<compile_context>
chip_gen: v6e
topology: v6e:2x2x1
jax: 0.10.0
libtpu: 0.0.40
codegen_flags: <defaults>
</compile_context>

<pallas_src>
import jax
import jax.numpy as jnp
from jax.experimental import pallas as pl
from jax.experimental.pallas import tpu as pltpu


def _round_up(x, m):
    return ((x + m - 1) // m) * m


def _pad2(a, rows, cols):
    return jnp.pad(a, ((0, rows - a.shape[0]), (0, cols - a.shape[1])))


# ----------------------------- kernels ------------------------------------- #

def _resblock_kernel_proj(x_ref, wcat_ref, bcat_ref, w2_ref, b2_ref, o_ref):
    """Projection shortcut. fc1 and shortcut are fused into one x-side GEMM:
    wcat = concat(w1, ws) along the output axis, bcat = concat(b1, bs)."""
    out_pad = w2_ref.shape[0]
    x = x_ref[...]                                           # [bm, in_pad], bf16/f32
    t = jnp.dot(x, wcat_ref[...],
                preferred_element_type=jnp.float32) + bcat_ref[...]   # [bm, 2*out_pad] f32
    h = jnp.tanh(t[:, :out_pad])                             # fc1 activation
    res = t[:, out_pad:]                                     # shortcut projection
    out = jnp.dot(h.astype(w2_ref.dtype), w2_ref[...],
                  preferred_element_type=jnp.float32) + b2_ref[...]
    o_ref[...] = jnp.tanh(out + res).astype(o_ref.dtype)


def _resblock_kernel_identity(x_ref, w1_ref, b1_ref, w2_ref, b2_ref, o_ref):
    """Identity shortcut (in_features == out_features)."""
    x = x_ref[...]
    h = jnp.tanh(jnp.dot(x, w1_ref[...],
                         preferred_element_type=jnp.float32) + b1_ref[...])
    out = jnp.dot(h.astype(w2_ref.dtype), w2_ref[...],
                  preferred_element_type=jnp.float32) + b2_ref[...]
    o_ref[...] = jnp.tanh(out + x.astype(jnp.float32)).astype(o_ref.dtype)


# ----------------------------- wrapper -------------------------------------- #

def residual_block(x, params, *, block_m=None, compute_dtype=jnp.bfloat16):
    """Apply ResidualBlock.forward: [batch, in_features] -> [batch, out_features].

    params: dict with 'w1' [in,out], 'b1' [1,out], 'w2' [out,out], 'b2' [1,out],
    and optionally 'ws' [in,out], 'bs' [1,out] (projection shortcut). Stored in
    f32; matmul operands are cast to `compute_dtype` (bf16 by default) with f32
    accumulation on the MXU.
    """
    n, in_f = x.shape
    out_f = params["w1"].shape[1]
    out_dtype = x.dtype
    has_shortcut = "ws" in params
    if not has_shortcut and in_f != out_f:
        raise ValueError("identity shortcut requires in_features == out_features")

    # Pad features to lane-dense multiples of 128 (K >= 128 for the MXU, and
    # unmasked lane-dense output stores); pad batch to the tile size.
    in_pad = _round_up(in_f, 128)
    out_pad = _round_up(out_f, 128)
    if block_m is None:
        block_m = max(8, min(256, _round_up(n, 8)))   # 256-512 is the sweet spot
    n_pad = _round_up(n, block_m)
    grid = (n_pad // block_m,)

    x_p = _pad2(x, n_pad, in_pad).astype(compute_dtype)
    w1 = _pad2(params["w1"], in_pad, out_pad).astype(compute_dtype)
    b1 = _pad2(params["b1"].reshape(1, -1), 1, out_pad).astype(jnp.float32)
    w2 = _pad2(params["w2"], out_pad, out_pad).astype(compute_dtype)
    b2 = _pad2(params["b2"].reshape(1, -1), 1, out_pad).astype(jnp.float32)

    if has_shortcut:
        ws = _pad2(params["ws"], in_pad, out_pad).astype(compute_dtype)
        bs = _pad2(params["bs"].reshape(1, -1), 1, out_pad).astype(jnp.float32)
        wcat = jnp.concatenate([w1, ws], axis=1)      # [in_pad, 2*out_pad]
        bcat = jnp.concatenate([b1, bs], axis=1)      # [1, 2*out_pad]
        kernel = _resblock_kernel_proj
        args = (x_p, wcat, bcat, w2, b2)
        w_first_cols = 2 * out_pad
    else:
        kernel = _resblock_kernel_identity
        args = (x_p, w1, b1, w2, b2)
        w_first_cols = out_pad

    x_spec = pl.BlockSpec((block_m, in_pad), lambda i: (i, 0))
    o_spec = pl.BlockSpec((block_m, out_pad), lambda i: (i, 0))

    def build(single_buffer_weights):
        # Weights/biases are grid-invariant -> single-buffer them so they are
        # not DMA'd/held twice in VMEM.
        kw = dict(pipeline_mode=pl.Buffered(1)) if single_buffer_weights else {}
        w_first_spec = pl.BlockSpec((in_pad, w_first_cols), lambda i: (0, 0), **kw)
        b_first_spec = pl.BlockSpec((1, w_first_cols), lambda i: (0, 0), **kw)
        w2_spec = pl.BlockSpec((out_pad, out_pad), lambda i: (0, 0), **kw)
        b2_spec = pl.BlockSpec((1, out_pad), lambda i: (0, 0), **kw)
        in_specs = [x_spec, w_first_spec, b_first_spec, w2_spec, b2_spec]

        # VMEM budget estimate: resident weights (+ biases) + double-buffered
        # x/out tiles + f32 intermediates.  Only raise the scoped-VMEM limit
        # when actually needed; cap well below physical (64 MiB/core on v7x).
        # TODO(synk): for very large feature dims (>~1.5K on v7x), additionally
        # tile out_features across a second "parallel" grid axis.
        c_item = jnp.dtype(compute_dtype).itemsize
        o_item = jnp.dtype(out_dtype).itemsize
        wbufs = 1 if single_buffer_weights else 2
        weight_bytes = (in_pad * w_first_cols + out_pad * out_pad) * c_item * wbufs
        tile_bytes = 2 * block_m * (in_pad * c_item + out_pad * o_item)
        live_f32 = block_m * (w_first_cols + 2 * out_pad) * 4
        est = weight_bytes + tile_bytes + live_f32 + (1 << 20)
        vmem_limit = None
        if est > 16 * 1024 * 1024:      # beyond the smallest (v5e) scoped default
            vmem_limit = min(int(est * 3 // 2), 100 * 1024 * 1024)

        return pl.pallas_call(
            kernel,
            out_shape=jax.ShapeDtypeStruct((n_pad, out_pad), out_dtype),
            grid_spec=pltpu.PrefetchScalarGridSpec(
                num_scalar_prefetch=0,
                grid=grid,
                in_specs=in_specs,
                out_specs=o_spec,
            ),
            compiler_params=pltpu.CompilerParams(
                dimension_semantics=("parallel",),
                vmem_limit_bytes=vmem_limit,
            ),
        )

    try:
        out = build(True)(*args)
    except Exception:
        # pipeline_mode=pl.Buffered(1) not supported by this JAX build; fall
        # back to default double-buffering of the grid-invariant weights.
        out = build(False)(*args)

    return out[:n, :out_f]


# ----------------------------- reference & init ----------------------------- #

def _q(a, dtype):
    """Round to `dtype` and back to f32 (mimics the kernel's MXU input rounding)."""
    return a if dtype is None else a.astype(dtype).astype(jnp.float32)


def residual_block_ref(x, params, compute_dtype=None):
    """Pure-JAX reference of the PyTorch forward. If compute_dtype is given,
    quantize matmul operands the same way the kernel does (f32 accumulate)."""
    xq = _q(x, compute_dtype)
    w1 = _q(params["w1"], compute_dtype)
    w2 = _q(params["w2"], compute_dtype)
    b1 = params["b1"].astype(jnp.float32)
    b2 = params["b2"].astype(jnp.float32)
    if "ws" in params:
        residual = xq @ _q(params["ws"], compute_dtype) + params["bs"].astype(jnp.float32)
    else:
        residual = xq
    h = _q(jnp.tanh(xq @ w1 + b1), compute_dtype)
    out = h @ w2 + b2
    return jnp.tanh(out + residual).astype(x.dtype)


def init_params(key, in_features, out_features):
    """Deterministic parameter init matching the PyTorch module's shapes.
    PyTorch nn.Linear stores weight as (out, in); we pre-transpose to (in, out)."""
    ks = jax.random.split(key, 6)
    scale1 = 1.0 / jnp.sqrt(in_features)
    scale2 = 1.0 / jnp.sqrt(out_features)
    params = {
        "w1": jax.random.uniform(ks[0], (out_features, in_features),
                                 minval=-scale1, maxval=scale1).T,
        "b1": jax.random.uniform(ks[1], (1, out_features),
                                 minval=-scale1, maxval=scale1),
        "w2": jax.random.uniform(ks[2], (out_features, out_features),
                                 minval=-scale2, maxval=scale2).T,
        "b2": jax.random.uniform(ks[3], (1, out_features),
                                 minval=-scale2, maxval=scale2),
    }
    if in_features != out_features:
        params["ws"] = jax.random.uniform(ks[4], (out_features, in_features),
                                          minval=-scale1, maxval=scale1).T
        params["bs"] = jax.random.uniform(ks[5], (1, out_features),
                                          minval=-scale1, maxval=scale1)
    return jax.tree_util.tree_map(lambda a: a.astype(jnp.float32), params)


if __name__ == "__main__":
    key = jax.random.PRNGKey(0)
    k_x, k_p1, k_p2, k_x2, k_x3 = jax.random.split(key, 5)

    batch, in_features, out_features = 16, 16, 32
    x = jax.random.normal(k_x, (batch, in_features), dtype=jnp.float32)

    # Case 1: projection shortcut (in != out), default bf16 MXU compute.
    params_proj = init_params(k_p1, in_features, out_features)
    y_proj = jax.block_until_ready(residual_block(x, params_proj))
    ref_proj = residual_block_ref(x, params_proj, compute_dtype=jnp.bfloat16)
    assert y_proj.shape == (batch, out_features)
    assert jnp.allclose(y_proj, ref_proj, atol=2e-3, rtol=2e-3)

    # Case 2: identity shortcut (in == out), bf16 compute.
    params_id = init_params(k_p2, out_features, out_features)
    x2 = jax.random.normal(k_x2, (batch, out_features), dtype=jnp.float32)
    y_id = jax.block_until_ready(residual_block(x2, params_id))
    ref_id = residual_block_ref(x2, params_id, compute_dtype=jnp.bfloat16)
    assert jnp.allclose(y_id, ref_id, atol=2e-3, rtol=2e-3)

    # Case 3: ragged batch (not a multiple of the tile) with f32 compute, tight check.
    x3 = jax.random.normal(k_x3, (13, in_features), dtype=jnp.float32)
    y3 = jax.block_until_ready(
        residual_block(x3, params_proj, compute_dtype=jnp.float32))
    ref3 = residual_block_ref(x3, params_proj)
    assert y3.shape == (13, out_features)
    assert jnp.allclose(y3, ref3, atol=1e-5, rtol=1e-5)

    print("KERNEL_OK")
</pallas_src>

<mosaic_0001>
module attributes {stable_mosaic.version = 11 : i64} {
  func.func @_resblock_kernel_proj(%arg0: i32, %arg1: memref<16x128xbf16, #tpu.memory_space<vmem>>, %arg2: memref<128x256xbf16, #tpu.memory_space<vmem>>, %arg3: memref<1x256xf32, #tpu.memory_space<vmem>>, %arg4: memref<128x128xbf16, #tpu.memory_space<vmem>>, %arg5: memref<1x128xf32, #tpu.memory_space<vmem>>, %arg6: memref<16x128xf32, #tpu.memory_space<vmem>>) attributes {dimension_semantics = [#tpu.dimension_semantics<parallel>], iteration_bounds = array<i64: 1>, scalar_prefetch = 0 : i64, scratch_operands = 0 : i64, tpu.core_type = #tpu.core_type<tc>, window_params = [{transform_indices = @transform_0, window_bounds = array<i64: 16, 128>}, {pipeline_mode = #tpu.pipeline_mode<synchronous>, transform_indices = @transform_1, window_bounds = array<i64: 128, 256>}, {pipeline_mode = #tpu.pipeline_mode<synchronous>, transform_indices = @transform_2, window_bounds = array<i64: 1, 256>}, {pipeline_mode = #tpu.pipeline_mode<synchronous>, transform_indices = @transform_3, window_bounds = array<i64: 128, 128>}, {pipeline_mode = #tpu.pipeline_mode<synchronous>, transform_indices = @transform_4, window_bounds = array<i64: 1, 128>}, {transform_indices = @transform_5, window_bounds = array<i64: 16, 128>}]} {
    %c0 = arith.constant 0 : index
    %c0_0 = arith.constant 0 : index
    %0 = vector.load %arg1[%c0, %c0_0] : memref<16x128xbf16, #tpu.memory_space<vmem>>, vector<16x128xbf16>
    %c0_1 = arith.constant 0 : index
    %c0_2 = arith.constant 0 : index
    %1 = vector.load %arg2[%c0_1, %c0_2] : memref<128x256xbf16, #tpu.memory_space<vmem>>, vector<128x256xbf16>
    %cst = arith.constant dense<0.000000e+00> : vector<16x256xf32>
    %2 = tpu.matmul %0, %1, %cst {dimension_numbers = #tpu.dot_dimension_numbers<[1], [0], [0], [1], [0, 0, 1, 1], [], []>} : vector<16x128xbf16>, vector<128x256xbf16>, vector<16x256xf32> -> vector<16x256xf32>
    %c0_3 = arith.constant 0 : index
    %c0_4 = arith.constant 0 : index
    %3 = vector.load %arg3[%c0_3, %c0_4] : memref<1x256xf32, #tpu.memory_space<vmem>>, vector<1x256xf32>
    %4 = vector.broadcast %3 : vector<1x256xf32> to vector<16x256xf32>
    %5 = arith.addf %2, %4 : vector<16x256xf32>
    %6 = vector.extract_strided_slice %5 {offsets = [0, 0], sizes = [16, 128], strides = [1, 1]} : vector<16x256xf32> to vector<16x128xf32>
    %7 = math.tanh %6 : vector<16x128xf32>
    %8 = vector.extract_strided_slice %5 {offsets = [0, 128], sizes = [16, 128], strides = [1, 1]} : vector<16x256xf32> to vector<16x128xf32>
    %9 = arith.truncf %7 : vector<16x128xf32> to vector<16x128xbf16>
    %c0_5 = arith.constant 0 : index
    %c0_6 = arith.constant 0 : index
    %10 = vector.load %arg4[%c0_5, %c0_6] : memref<128x128xbf16, #tpu.memory_space<vmem>>, vector<128x128xbf16>
    %cst_7 = arith.constant dense<0.000000e+00> : vector<16x128xf32>
    %11 = tpu.matmul %9, %10, %cst_7 {dimension_numbers = #tpu.dot_dimension_numbers<[1], [0], [0], [1], [0, 0, 1, 1], [], []>} : vector<16x128xbf16>, vector<128x128xbf16>, vector<16x128xf32> -> vector<16x128xf32>
    %c0_8 = arith.constant 0 : index
    %c0_9 = arith.constant 0 : index
    %12 = vector.load %arg5[%c0_8, %c0_9] : memref<1x128xf32, #tpu.memory_space<vmem>>, vector<1x128xf32>
    %13 = vector.broadcast %12 : vector<1x128xf32> to vector<16x128xf32>
    %14 = arith.addf %11, %13 : vector<16x128xf32>
    %15 = arith.addf %14, %8 : vector<16x128xf32>
    %16 = math.tanh %15 : vector<16x128xf32>
    %c0_10 = arith.constant 0 : index
    %c0_11 = arith.constant 0 : index
    %17 = vector.load %arg6[%c0_10, %c0_11] : memref<16x128xf32, #tpu.memory_space<vmem>>, vector<16x128xf32>
    tpu.vector_store %arg6[%c0_10, %c0_11], %16 {strides = array<i32>} : memref<16x128xf32, #tpu.memory_space<vmem>>, vector<16x128xf32>,
    return
  }
  func.func @transform_0(%arg0: i32) -> (i32, i32) {
    %c0_i32 = arith.constant 0 : i32
    %c0_i32_0 = arith.constant 0 : i32
    return %arg0, %c0_i32 : i32, i32
  }
  func.func @transform_1(%arg0: i32) -> (i32, i32) {
    %c0_i32 = arith.constant 0 : i32
    %c0_i32_0 = arith.constant 0 : i32
    %c0_i32_1 = arith.constant 0 : i32
    return %c0_i32, %c0_i32_0 : i32, i32
  }
  func.func @transform_2(%arg0: i32) -> (i32, i32) {
    %c0_i32 = arith.constant 0 : i32
    %c0_i32_0 = arith.constant 0 : i32
    %c0_i32_1 = arith.constant 0 : i32
    return %c0_i32, %c0_i32_0 : i32, i32
  }
  func.func @transform_3(%arg0: i32) -> (i32, i32) {
    %c0_i32 = arith.constant 0 : i32
    %c0_i32_0 = arith.constant 0 : i32
    %c0_i32_1 = arith.constant 0 : i32
    return %c0_i32, %c0_i32_0 : i32, i32
  }
  func.func @transform_4(%arg0: i32) -> (i32, i32) {
    %c0_i32 = arith.constant 0 : i32
    %c0_i32_0 = arith.constant 0 : i32
    %c0_i32_1 = arith.constant 0 : i32
    return %c0_i32, %c0_i32_0 : i32, i32
  }
  func.func @transform_5(%arg0: i32) -> (i32, i32) {
    %c0_i32 = arith.constant 0 : i32
    %c0_i32_0 = arith.constant 0 : i32
    return %arg0, %c0_i32 : i32, i32
  }
}

module attributes {stable_mosaic.version = 11 : i64} {
  func.func @_resblock_kernel_proj(%arg0: i32, %arg1: memref<16x128xbf16, #tpu.memory_space<vmem>>, %arg2: memref<128x256xbf16, #tpu.memory_space<vmem>>, %arg3: memref<1x256xf32, #tpu.memory_space<vmem>>, %arg4: memref<128x128xbf16, #tpu.memory_space<vmem>>, %arg5: memref<1x128xf32, #tpu.memory_space<vmem>>, %arg6: memref<16x128xf32, #tpu.memory_space<vmem>>) attributes {dimension_semantics = [#tpu.dimension_semantics<parallel>], iteration_bounds = array<i64: 1>, scalar_prefetch = 0 : i64, scratch_operands = 0 : i64, tpu.core_type = #tpu.core_type<tc>, window_params = [{transform_indices = @transform_0, window_bounds = array<i64: 16, 128>}, {pipeline_mode = #tpu.pipeline_mode<synchronous>, transform_indices = @transform_1, window_bounds = array<i64: 128, 256>}, {pipeline_mode = #tpu.pipeline_mode<synchronous>, transform_indices = @transform_2, window_bounds = array<i64: 1, 256>}, {pipeline_mode = #tpu.pipeline_mode<synchronous>, transform_indices = @transform_3, window_bounds = array<i64: 128, 128>}, {pipeline_mode = #tpu.pipeline_mode<synchronous>, transform_indices = @transform_4, window_bounds = array<i64: 1, 128>}, {transform_indices = @transform_5, window_bounds = array<i64: 16, 128>}]} {
    %c0 = arith.constant 0 : index
    %c0_0 = arith.constant 0 : index
    %0 = vector.load %arg1[%c0, %c0_0] : memref<16x128xbf16, #tpu.memory_space<vmem>>, vector<16x128xbf16>
    %c0_1 = arith.constant 0 : index
    %c0_2 = arith.constant 0 : index
    %1 = vector.load %arg2[%c0_1, %c0_2] : memref<128x256xbf16, #tpu.memory_space<vmem>>, vector<128x256xbf16>
    %cst = arith.constant dense<0.000000e+00> : vector<16x256xf32>
    %2 = tpu.matmul %0, %1, %cst {dimension_numbers = #tpu.dot_dimension_numbers<[1], [0], [0], [1], [0, 0, 1, 1], [], []>} : vector<16x128xbf16>, vector<128x256xbf16>, vector<16x256xf32> -> vector<16x256xf32>
    %c0_3 = arith.constant 0 : index
    %c0_4 = arith.constant 0 : index
    %3 = vector.load %arg3[%c0_3, %c0_4] : memref<1x256xf32, #tpu.memory_space<vmem>>, vector<1x256xf32>
    %4 = vector.broadcast %3 : vector<1x256xf32> to vector<16x256xf32>
    %5 = arith.addf %2, %4 : vector<16x256xf32>
    %6 = vector.extract_strided_slice %5 {offsets = [0, 0], sizes = [16, 128], strides = [1, 1]} : vector<16x256xf32> to vector<16x128xf32>
    %7 = math.tanh %6 : vector<16x128xf32>
    %8 = vector.extract_strided_slice %5 {offsets = [0, 128], sizes = [16, 128], strides = [1, 1]} : vector<16x256xf32> to vector<16x128xf32>
    %9 = arith.truncf %7 : vector<16x128xf32> to vector<16x128xbf16>
    %c0_5 = arith.constant 0 : index
    %c0_6 = arith.constant 0 : index
    %10 = vector.load %arg4[%c0_5, %c0_6] : memref<128x128xbf16, #tpu.memory_space<vmem>>, vector<128x128xbf16>
    %cst_7 = arith.constant dense<0.000000e+00> : vector<16x128xf32>
    %11 = tpu.matmul %9, %10, %cst_7 {dimension_numbers = #tpu.dot_dimension_numbers<[1], [0], [0], [1], [0, 0, 1, 1], [], []>} : vector<16x128xbf16>, vector<128x128xbf16>, vector<16x128xf32> -> vector<16x128xf32>
    %c0_8 = arith.constant 0 : index
    %c0_9 = arith.constant 0 : index
    %12 = vector.load %arg5[%c0_8, %c0_9] : memref<1x128xf32, #tpu.memory_space<vmem>>, vector<1x128xf32>
    %13 = vector.broadcast %12 : vector<1x128xf32> to vector<16x128xf32>
    %14 = arith.addf %11, %13 : vector<16x128xf32>
    %15 = arith.addf %14, %8 : vector<16x128xf32>
    %16 = math.tanh %15 : vector<16x128xf32>
    %c0_10 = arith.constant 0 : index
    %c0_11 = arith.constant 0 : index
    %17 = vector.load %arg6[%c0_10, %c0_11] : memref<16x128xf32, #tpu.memory_space<vmem>>, vector<16x128xf32>
    tpu.vector_store %arg6[%c0_10, %c0_11], %16 {strides = array<i32>} : memref<16x128xf32, #tpu.memory_space<vmem>>, vector<16x128xf32>,
    return
  }
  func.func @transform_0(%arg0: i32) -> (i32, i32) {
    %c0_i32 = arith.constant 0 : i32
    %c0_i32_0 = arith.constant 0 : i32
    return %arg0, %c0_i32 : i32, i32
  }
  func.func @transform_1(%arg0: i32) -> (i32, i32) {
    %c0_i32 = arith.constant 0 : i32
    %c0_i32_0 = arith.constant 0 : i32
    %c0_i32_1 = arith.constant 0 : i32
    return %c0_i32, %c0_i32_0 : i32, i32
  }
  func.func @transform_2(%arg0: i32) -> (i32, i32) {
    %c0_i32 = arith.constant 0 : i32
    %c0_i32_0 = arith.constant 0 : i32
    %c0_i32_1 = arith.constant 0 : i32
    return %c0_i32, %c0_i32_0 : i32, i32
  }
  func.func @transform_3(%arg0: i32) -> (i32, i32) {
    %c0_i32 = arith.constant 0 : i32
    %c0_i32_0 = arith.constant 0 : i32
    %c0_i32_1 = arith.constant 0 : i32
    return %c0_i32, %c0_i32_0 : i32, i32
  }
  func.func @transform_4(%arg0: i32) -> (i32, i32) {
    %c0_i32 = arith.constant 0 : i32
    %c0_i32_0 = arith.constant 0 : i32
    %c0_i32_1 = arith.constant 0 : i32
    return %c0_i32, %c0_i32_0 : i32, i32
  }
  func.func @transform_5(%arg0: i32) -> (i32, i32) {
    %c0_i32 = arith.constant 0 : i32
    %c0_i32_0 = arith.constant 0 : i32
    return %arg0, %c0_i32 : i32, i32
  }
}

</mosaic_0001>

<bundles_post_ra>
// kernel: tpu_custom_call.1
= control target key start
LH: loop header
LB: loop body
LE: loop exit
PB: predicated region body
PF: predicated region fallthrough
CT: control target
= control target key end

     0   :  { %10 = vsyncpa [#allocation3], 0  ;;  %s619_s0 = inlined_call_operand.hbm [shape: bf16[16,128], index: 0, kind: input, shape index: {}]   ;;  %s620_s1 = inlined_call_operand.hbm [shape: bf16[128,256], index: 1, kind: input, shape index: {}]   ;;  %s621_s2 = inlined_call_operand.vmem [shape: f32[1,256], index: 2, kind: input, shape index: {}]   ;;  %s622_s3 = inlined_call_operand.hbm [shape: bf16[128,128], index: 3, kind: input, shape index: {}]   ;;  %s623_s4 = inlined_call_operand.vmem [shape: f32[1,128], index: 4, kind: input, shape index: {}]   ;;  %s624_s5 = inlined_call_operand.hbm [shape: f32[16,128], index: 5, kind: output, shape index: {}]  }
   0x1   :  { %11 = vsyncpa [#allocation6], 0 }
   0x2   :  { %12 = vsyncpa [#allocation4], 0  ;;  %s554_s18 = smov [#allocation5]  }
   0x3   :  { %s30_s19 = sshll.u32 %s554_s18, 4  ;;  %s31_s19 = int_to_ptr.vmem [resolvable:$true] %s30_s19 }
   0x4   :  { %s476_s20 = scalar_lea.vmem %s31_s19, 2048  ;;  %p481_p1 = scmp.lt.s32.totalorder %s31_s19, %s31_s19 }
   0x5   :  { %p477_p0 = scmp.ne.s32.totalorder %s31_s19, %s476_s20  ;;  %p482_p2 = scmp.lt.s32.totalorder %s476_s20, %s476_s20 }
   0x7   :  { %p483_p3 = por %p482_p2, %p481_p1 }
   0x9   :  { %p484_p4 = pnand %p483_p3, %p477_p0 }
   0xb   :  { %487 = shalt.err (!%p484_p4)
}
   0xc   :  { %s555_s21 = smov 128   ;;  %s556_s22 = smov 8  }
   0xd   :  { %36 = dma.hbm_to_vmem [thread:$0]  %s620_s1, 2048, %s31_s19, [#allocation6], %s555_s21, %s555_s21, %s556_s22  }
   0xe   :  { %s557_s25 = smov [#allocation2]  }
   0xf   :  { %s18_s26 = sshll.u32 %s557_s25, 4  ;;  %s19_s26 = int_to_ptr.vmem [resolvable:$true] %s18_s26 }
  0x10   :  { %s496_s27 = scalar_lea.vmem %s19_s26, 128  ;;  %p501_p6 = scmp.lt.s32.totalorder %s19_s26, %s19_s26 }
  0x11   :  { %p497_p5 = scmp.ne.s32.totalorder %s19_s26, %s496_s27  ;;  %p502_p7 = scmp.lt.s32.totalorder %s496_s27, %s496_s27 }
  0x13   :  { %p503_p8 = por %p502_p7, %p501_p6 }
  0x15   :  { %p504_p9 = pnand %p503_p8, %p497_p5 }
  0x17   :  { %507 = shalt.err (!%p504_p9)
}
  0x18   :  { %s558_s28 = smov 64   ;;  %s559_s29 = smov 4  }
  0x19   :  { %24 = dma.hbm_to_vmem [thread:$0]  %s619_s0, 128, %s19_s26, [#allocation3], %s558_s28, %s558_s28, %s559_s29  }
  0x1a   :  { %s560_s7 = smov [#allocation7]  }
  0x1b   :  { %s44_s8 = sshll.u32 %s560_s7, 4  ;;  %s45_s8 = int_to_ptr.vmem [resolvable:$true] %s44_s8 }
  0x1c   :  { %s516_s1 = scalar_lea.vmem %s45_s8, 1024  ;;  %p521_p11 = scmp.lt.s32.totalorder %s45_s8, %s45_s8 }
  0x1d   :  { %p517_p10 = scmp.ne.s32.totalorder %s45_s8, %s516_s1  ;;  %p522_p12 = scmp.lt.s32.totalorder %s516_s1, %s516_s1 }
  0x1f   :  { %p523_p13 = por %p522_p12, %p521_p11 }
  0x21   :  { %p524_p0 = pnand %p523_p13, %p517_p10 }
  0x23   :  { %527 = shalt.err (!%p524_p0)
}
  0x24   :  { %50 = dma.hbm_to_vmem [thread:$0]  %s622_s3, 1024, %s45_s8, [#allocation6], %s558_s28, %s558_s28, %s559_s29  }
  0x25   :  { %548 = dma.done.wait [#allocation3], 128  }
  0x26   :  { %549 = vsyncadd [#allocation3], 4294967168 }
  0x27   :  { %550 = dma.done.wait [#allocation6], 3072  }
  0x28   :  { %551 = vsyncadd [#allocation6], 4294964224  ;;  %v561_v0 = vmov 0   ;;  %v562_v1 = vmov 0.0   ;;  %v427_v2 = vld [vmem:[#allocation5 + $0x74] ss:$8 sps:$4 sm:$0xff]   ;;  %v83_v27 = vlaneseq }
  0x29   :  { %211 = vmatprep.mubr.bf16.mxu0 %v561_v0  ;;  %396 = vmatprep.subr.bf16.mxu1 %v562_v1  ;;  %v429_v3 = vld [vmem:[#allocation5 + $0x70] ss:$8 sps:$4 sm:$0xff]   ;;  %v430_v4 = vld [vmem:[#allocation5 + $0x64] ss:$8 sps:$4 sm:$0xff]   ;;  %v432_v5 = vld [vmem:[#allocation5 + $0x60] ss:$8 sps:$4 sm:$0xff]  }
  0x2a   :  { %179 = vmatprep.subr.bf16.mxu0 %v427_v2  ;;  %v433_v6 = vld [vmem:[#allocation5 + $0x54] ss:$8 sps:$4 sm:$0xff]   ;;  %v435_v7 = vld [vmem:[#allocation5 + $0x50] ss:$8 sps:$4 sm:$0xff]   ;;  %v436_v8 = vld [vmem:[#allocation5 + $0x44] ss:$8 sps:$4 sm:$0xff]  }
  0x2b   :  { %180 = vmatpush1.bf16.msra.mxu0 %v429_v3  ;;  %v438_v9 = vld [vmem:[#allocation5 + $0x40] ss:$8 sps:$4 sm:$0xff]   ;;  %v439_v10 = vld [vmem:[#allocation5 + $0x34] ss:$8 sps:$4 sm:$0xff]   ;;  %v441_v12 = vld [vmem:[#allocation5 + $0x30] ss:$8 sps:$4 sm:$0xff]  }
  0x2c   :  { %181 = vmatprep.subr.bf16.mxu0 %v430_v4  ;;  %v452_v11 = vld [vmem:[#allocation7 + $0x38] sm:$0xff]   ;;  %v453_v13 = vld [vmem:[#allocation7 + $0x30] sm:$0xff]   ;;  %v442_v14 = vld [vmem:[#allocation5 + $0x24] ss:$8 sps:$4 sm:$0xff]   ;;  %vm563_vm0 = vmmov 0   ;;  %v84_v28 = vshrl.u32 %v83_v27, 7 }
  0x2d   :  { %397 = vmatpush3.bf16.msra.mxu1 %v452_v11  ;;  %v444_v15 = vld [vmem:[#allocation5 + $0x20] ss:$8 sps:$4 sm:$0xff]   ;;  %v445_v16 = vld [vmem:[#allocation5 + $0x14] ss:$8 sps:$4 sm:$0xff]   ;;  %v447_v17 = vld [vmem:[#allocation5 + $0x10] ss:$8 sps:$4 sm:$0xff]   ;;  %412 = vmatprep.mubr.msk.bf16.mxu1 %vm563_vm0, %v562_v1 }
  0x2e   :  { %398 = vmatprep.subr.bf16.mxu1 %v562_v1  ;;  %v448_v18 = vld [vmem:[#allocation5 + $0x4] ss:$8 sps:$4 sm:$0xff]   ;;  %v450_v19 = vld [vmem:[#allocation5] ss:$8 sps:$4 sm:$0xff]   ;;  %v451_v20 = vld [vmem:[#allocation2] sm:$0xff]   ;;  %v85_v29 = vsub.s32 0, %v84_v28 }
  0x2f   :  { %182 = vmatpush1.bf16.msra.mxu0 %v432_v5  ;;  %v454_v21 = vld [vmem:[#allocation7 + $0x28] sm:$0xff]   ;;  %v455_v22 = vld [vmem:[#allocation7 + $0x20] sm:$0xff]   ;;  %v456_v23 = vld [vmem:[#allocation7 + $0x18] sm:$0xff]   ;;  %v89_v40 = vsub.s32 1, %v84_v28 }
  0x30   :  { %183 = vmatprep.subr.bf16.mxu0 %v433_v6  ;;  %v457_v24 = vld [vmem:[#allocation7 + $0x10] sm:$0xff]   ;;  %v458_v25 = vld [vmem:[#allocation7 + $0x8] sm:$0xff]   ;;  %v459_v26 = vld [vmem:[#allocation7] sm:$0xff]  }
  0x31   :  { %399 = vmatpush3.bf16.msra.mxu1 %v453_v13  ;;  %v81_v30 = vld [vmem:[%s621_s2] sm:$0x3]  ;;  %s564_s2 = smov [#allocation8]  }
  0x32   :  { %400 = vmatprep.subr.bf16.mxu1 %v562_v1  ;;  %v86_v31 = vrot.slane %v81_v30, %v85_v29  ;;  %v90_v41 = vrot.slane %v81_v30, %v89_v40  ;;  %v378_v42 = vld [vmem:[%s623_s4] ss:$0 sm:$0xff]  ;;  %s348_s13 = sshll.u32 %s564_s2, 4  ;;  %s349_s13 = int_to_ptr.vmem [resolvable:$true] %s348_s13 }
  0x33   :  { %184 = vmatpush1.bf16.msra.mxu0 %v435_v7  ;;  %s528_s4 = scalar_lea.vmem %s349_s13, 256  ;;  %p533_p2 = scmp.lt.s32.totalorder %s349_s13, %s349_s13 }
  0x34   :  { %185 = vmatprep.subr.bf16.mxu0 %v436_v8  ;;  %p529_p1 = scmp.ne.s32.totalorder %s349_s13, %s528_s4  ;;  %p534_p3 = scmp.lt.s32.totalorder %s528_s4, %s528_s4 }
  0x35   :  { %401 = vmatpush3.bf16.msra.mxu1 %v454_v21 }
  0x36   :  { %402 = vmatprep.subr.bf16.mxu1 %v562_v1  ;;  %p535_p4 = por %p534_p3, %p533_p2 }
  0x37   :  { %186 = vmatpush1.bf16.msra.mxu0 %v438_v9 }
  0x38   :  { %187 = vmatprep.subr.bf16.mxu0 %v439_v10  ;;  %p536_p5 = pnand %p535_p4, %p529_p1 }
  0x39   :  { %403 = vmatpush3.bf16.msra.mxu1 %v455_v22 }
  0x3a   :  { %404 = vmatprep.subr.bf16.mxu1 %v562_v1 }
  0x3b   :  { %188 = vmatpush1.bf16.msra.mxu0 %v441_v12 }
  0x3c   :  { %189 = vmatprep.subr.bf16.mxu0 %v442_v14 }
  0x3d   :  { %405 = vmatpush3.bf16.msra.mxu1 %v456_v23 }
  0x3e   :  { %406 = vmatprep.subr.bf16.mxu1 %v562_v1 }
  0x3f   :  { %190 = vmatpush1.bf16.msra.mxu0 %v444_v15 }
  0x40   :  { %191 = vmatprep.subr.bf16.mxu0 %v445_v16 }
  0x41   :  { %407 = vmatpush3.bf16.msra.mxu1 %v457_v24 }
  0x42   :  { %408 = vmatprep.subr.bf16.mxu1 %v562_v1 }
  0x43   :  { %192 = vmatpush1.bf16.msra.mxu0 %v447_v17 }
  0x44   :  { %193 = vmatprep.subr.bf16.mxu0 %v448_v18 }
  0x45   :  { %409 = vmatpush3.bf16.msra.mxu1 %v458_v25 }
  0x46   :  { %410 = vmatprep.subr.bf16.mxu1 %v562_v1 }
  0x47   :  { %194 = vmatpush1.bf16.msra.mxu0 %v450_v19 }
  0x49   :  { %411 = vmatpush3.bf16.msra.mxu1 %v459_v26 }
  0x4a   :  { %212 = vmatmul.mubr.bf16.vlgmr.msra.gmra.mxu0 %v451_v20 }
 0x10a   :  { %v213_v32 = vpop.f32.mrf.mxu0 }
 0x10b   :  { %v214_v33 = vadd.f32 %v213_v32, %v86_v31 }
 0x10c   :  { %v215_v34 = vpop.f32.mrf.mxu0 }
 0x10d   :  { %460 = vtanh.f32 %v214_v33  ;;  %v216_v44 = vadd.f32 %v215_v34, %v90_v41 }
 0x10e   :  { %v217_v35 = vpop.f32.mrf.mxu0 }
 0x10f   :  { %v218_v36 = vadd.f32 %v217_v35, %v86_v31 }
 0x110   :  { %v219_v46 = vpop.f32.mrf.mxu0 }
 0x111   :  { %462 = vtanh.f32 %v218_v36  ;;  %v220_v50 = vadd.f32 %v219_v46, %v90_v41 }
 0x11a   :  { %v461_v37 = vpop.eup %460 }
 0x11e   :  { %v463_v38 = vpop.eup %462 }
 0x11f   :  { %v224_v39 = vpack.c.bf16 %v463_v38, %v461_v37 }
 0x121   :  { %413 = vmatmul.mubr.bf16.vlgmr.msra.gmra.mxu1 %v224_v39 }
 0x1e1   :  { %v330_v43 = vpop.f32.mrf.mxu1 }
 0x1e2   :  { %v331_v45 = vadd.f32 %v378_v42, %v330_v43 }
 0x1e3   :  { %v414_v47 = vpop.f32.mrf.mxu1 }
 0x1e4   :  { %v337_v48 = vadd.f32 %v331_v45, %v216_v44 }
 0x1e5   :  { %v333_v49 = vpop.f32.mrf.mxu1 }
 0x1e6   :  { %464 = vtanh.f32 %v337_v48  ;;  %v334_v51 = vadd.f32 %v378_v42, %v333_v49 }
 0x1e7   :  { %v415_v52 = vpop.f32.mrf.mxu1 }
 0x1e8   :  { %v338_v53 = vadd.f32 %v334_v51, %v220_v50 }
 0x1ea   :  { %466 = vtanh.f32 %v338_v53 }
 0x1f3   :  { %v465_v54 = vpop.eup %464 }
 0x1f4   :  { %341 = vst [vmem:[#allocation8] sm:$0xff] %v465_v54 }
 0x1f7   :  { %v467_v55 = vpop.eup %466 }
 0x1f8   :  { %342 = vst [vmem:[#allocation8 + $0x8] sm:$0xff] %v467_v55 }
 0x1f9   :  { %539 = shalt.err (!%p536_p5)
}
 0x1fa   :  { %354 = dma.vmem_to_hbm [thread:$0]  %s349_s13, 256, %s624_s5, [#allocation4], %s555_s21, %s555_s21, %s556_s22  }
 0x1fb   :  { %552 = dma.done.wait [#allocation4], 256  }
 0x1fc   :  { %553 = vsyncadd [#allocation4], 4294967040 }
 0x1fd   :  { %358 = vsyncpa [#allocation3], 1 }
 0x1fe   :  { %359 = vsyncpa [#allocation6], 1 }
 0x1ff   :  { %360 = vsyncpa [#allocation4], 1 }

// kernel: tpu_custom_call.1
= control target key start
LH: loop header
LB: loop body
LE: loop exit
PB: predicated region body
PF: predicated region fallthrough
CT: control target
= control target key end

     0   :  { %10 = vsyncpa [#allocation3], 0  ;;  %s619_s0 = inlined_call_operand.hbm [shape: bf16[16,128], index: 0, kind: input, shape index: {}]   ;;  %s620_s1 = inlined_call_operand.hbm [shape: bf16[128,256], index: 1, kind: input, shape index: {}]   ;;  %s621_s2 = inlined_call_operand.vmem [shape: f32[1,256], index: 2, kind: input, shape index: {}]   ;;  %s622_s3 = inlined_call_operand.hbm [shape: bf16[128,128], index: 3, kind: input, shape index: {}]   ;;  %s623_s4 = inlined_call_operand.vmem [shape: f32[1,128], index: 4, kind: input, shape index: {}]   ;;  %s624_s5 = inlined_call_operand.hbm [shape: f32[16,128], index: 5, kind: output, shape index: {}]  }
   0x1   :  { %11 = vsyncpa [#allocation6], 0 }
   0x2   :  { %12 = vsyncpa [#allocation4], 0  ;;  %s554_s18 = smov [#allocation5]  }
   0x3   :  { %s30_s19 = sshll.u32 %s554_s18, 4  ;;  %s31_s19 = int_to_ptr.vmem [resolvable:$true] %s30_s19 }
   0x4   :  { %s476_s20 = scalar_lea.vmem %s31_s19, 2048  ;;  %p481_p1 = scmp.lt.s32.totalorder %s31_s19, %s31_s19 }
   0x5   :  { %p477_p0 = scmp.ne.s32.totalorder %s31_s19, %s476_s20  ;;  %p482_p2 = scmp.lt.s32.totalorder %s476_s20, %s476_s20 }
   0x7   :  { %p483_p3 = por %p482_p2, %p481_p1 }
   0x9   :  { %p484_p4 = pnand %p483_p3, %p477_p0 }
   0xb   :  { %487 = shalt.err (!%p484_p4)
}
   0xc   :  { %s555_s21 = smov 128   ;;  %s556_s22 = smov 8  }
   0xd   :  { %36 = dma.hbm_to_vmem [thread:$0]  %s620_s1, 2048, %s31_s19, [#allocation6], %s555_s21, %s555_s21, %s556_s22  }
   0xe   :  { %s557_s25 = smov [#allocation2]  }
   0xf   :  { %s18_s26 = sshll.u32 %s557_s25, 4  ;;  %s19_s26 = int_to_ptr.vmem [resolvable:$true] %s18_s26 }
  0x10   :  { %s496_s27 = scalar_lea.vmem %s19_s26, 128  ;;  %p501_p6 = scmp.lt.s32.totalorder %s19_s26, %s19_s26 }
  0x11   :  { %p497_p5 = scmp.ne.s32.totalorder %s19_s26, %s496_s27  ;;  %p502_p7 = scmp.lt.s32.totalorder %s496_s27, %s496_s27 }
  0x13   :  { %p503_p8 = por %p502_p7, %p501_p6 }
  0x15   :  { %p504_p9 = pnand %p503_p8, %p497_p5 }
  0x17   :  { %507 = shalt.err (!%p504_p9)
}
  0x18   :  { %s558_s28 = smov 64   ;;  %s559_s29 = smov 4  }
  0x19   :  { %24 = dma.hbm_to_vmem [thread:$0]  %s619_s0, 128, %s19_s26, [#allocation3], %s558_s28, %s558_s28, %s559_s29  }
  0x1a   :  { %s560_s7 = smov [#allocation7]  }
  0x1b   :  { %s44_s8 = sshll.u32 %s560_s7, 4  ;;  %s45_s8 = int_to_ptr.vmem [resolvable:$true] %s44_s8 }
  0x1c   :  { %s516_s1 = scalar_lea.vmem %s45_s8, 1024  ;;  %p521_p11 = scmp.lt.s32.totalorder %s45_s8, %s45_s8 }
  0x1d   :  { %p517_p10 = scmp.ne.s32.totalorder %s45_s8, %s516_s1  ;;  %p522_p12 = scmp.lt.s32.totalorder %s516_s1, %s516_s1 }
  0x1f   :  { %p523_p13 = por %p522_p12, %p521_p11 }
  0x21   :  { %p524_p0 = pnand %p523_p13, %p517_p10 }
  0x23   :  { %527 = shalt.err (!%p524_p0)
}
  0x24   :  { %50 = dma.hbm_to_vmem [thread:$0]  %s622_s3, 1024, %s45_s8, [#allocation6], %s558_s28, %s558_s28, %s559_s29  }
  0x25   :  { %548 = dma.done.wait [#allocation3], 128  }
  0x26   :  { %549 = vsyncadd [#allocation3], 4294967168 }
  0x27   :  { %550 = dma.done.wait [#allocation6], 3072  }
  0x28   :  { %551 = vsyncadd [#allocation6], 4294964224  ;;  %v561_v0 = vmov 0   ;;  %v562_v1 = vmov 0.0   ;;  %v427_v2 = vld [vmem:[#allocation5 + $0x74] ss:$8 sps:$4 sm:$0xff]   ;;  %v83_v27 = vlaneseq }
  0x29   :  { %211 = vmatprep.mubr.bf16.mxu0 %v561_v0  ;;  %396 = vmatprep.subr.bf16.mxu1 %v562_v1  ;;  %v429_v3 = vld [vmem:[#allocation5 + $0x70] ss:$8 sps:$4 sm:$0xff]   ;;  %v430_v4 = vld [vmem:[#allocation5 + $0x64] ss:$8 sps:$4 sm:$0xff]   ;;  %v432_v5 = vld [vmem:[#allocation5 + $0x60] ss:$8 sps:$4 sm:$0xff]  }
  0x2a   :  { %179 = vmatprep.subr.bf16.mxu0 %v427_v2  ;;  %v433_v6 = vld [vmem:[#allocation5 + $0x54] ss:$8 sps:$4 sm:$0xff]   ;;  %v435_v7 = vld [vmem:[#allocation5 + $0x50] ss:$8 sps:$4 sm:$0xff]   ;;  %v436_v8 = vld [vmem:[#allocation5 + $0x44] ss:$8 sps:$4 sm:$0xff]  }
  0x2b   :  { %180 = vmatpush1.bf16.msra.mxu0 %v429_v3  ;;  %v438_v9 = vld [vmem:[#allocation5 + $0x40] ss:$8 sps:$4 sm:$0xff]   ;;  %v439_v10 = vld [vmem:[#allocation5 + $0x34] ss:$8 sps:$4 sm:$0xff]   ;;  %v441_v12 = vld [vmem:[#allocation5 + $0x30] ss:$8 sps:$4 sm:$0xff]  }
  0x2c   :  { %181 = vmatprep.subr.bf16.mxu0 %v430_v4  ;;  %v452_v11 = vld [vmem:[#allocation7 + $0x38] sm:$0xff]   ;;  %v453_v13 = vld [vmem:[#allocation7 + $0x30] sm:$0xff]   ;;  %v442_v14 = vld [vmem:[#allocation5 + $0x24] ss:$8 sps:$4 sm:$0xff]   ;;  %vm563_vm0 = vmmov 0   ;;  %v84_v28 = vshrl.u32 %v83_v27, 7 }
  0x2d   :  { %397 = vmatpush3.bf16.msra.mxu1 %v452_v11  ;;  %v444_v15 = vld [vmem:[#allocation5 + $0x20] ss:$8 sps:$4 sm:$0xff]   ;;  %v445_v16 = vld [vmem:[#allocation5 + $0x14] ss:$8 sps:$4 sm:$0xff]   ;;  %v447_v17 = vld [vmem:[#allocation5 + $0x10] ss:$8 sps:$4 sm:$0xff]   ;;  %412 = vmatprep.mubr.msk.bf16.mxu1 %vm563_vm0, %v562_v1 }
  0x2e   :  { %398 = vmatprep.subr.bf16.mxu1 %v562_v1  ;;  %v448_v18 = vld [vmem:[#allocation5 + $0x4] ss:$8 sps:$4 sm:$0xff]   ;;  %v450_v19 = vld [vmem:[#allocation5] ss:$8 sps:$4 sm:$0xff]   ;;  %v451_v20 = vld [vmem:[#allocation2] sm:$0xff]   ;;  %v85_v29 = vsub.s32 0, %v84_v28 }
  0x2f   :  { %182 = vmatpush1.bf16.msra.mxu0 %v432_v5  ;;  %v454_v21 = vld [vmem:[#allocation7 + $0x28] sm:$0xff]   ;;  %v455_v22 = vld [vmem:[#allocation7 + $0x20] sm:$0xff]   ;;  %v456_v23 = vld [vmem:[#allocation7 + $0x18] sm:$0xff]   ;;  %v89_v40 = vsub.s32 1, %v84_v28 }
  0x30   :  { %183 = vmatprep.subr.bf16.mxu0 %v433_v6  ;;  %v457_v24 = vld [vmem:[#allocation7 + $0x10] sm:$0xff]   ;;  %v458_v25 = vld [vmem:[#allocation7 + $0x8] sm:$0xff]   ;;  %v459_v26 = vld [vmem:[#allocation7] sm:$0xff]  }
  0x31   :  { %399 = vmatpush3.bf16.msra.mxu1 %v453_v13  ;;  %v81_v30 = vld [vmem:[%s621_s2] sm:$0x3]  ;;  %s564_s2 = smov [#allocation8]  }
  0x32   :  { %400 = vmatprep.subr.bf16.mxu1 %v562_v1  ;;  %v86_v31 = vrot.slane %v81_v30, %v85_v29  ;;  %v90_v41 = vrot.slane %v81_v30, %v89_v40  ;;  %v378_v42 = vld [vmem:[%s623_s4] ss:$0 sm:$0xff]  ;;  %s348_s13 = sshll.u32 %s564_s2, 4  ;;  %s349_s13 = int_to_ptr.vmem [resolvable:$true] %s348_s13 }
  0x33   :  { %184 = vmatpush1.bf16.msra.mxu0 %v435_v7  ;;  %s528_s4 = scalar_lea.vmem %s349_s13, 256  ;;  %p533_p2 = scmp.lt.s32.totalorder %s349_s13, %s349_s13 }
  0x34   :  { %185 = vmatprep.subr.bf16.mxu0 %v436_v8  ;;  %p529_p1 = scmp.ne.s32.totalorder %s349_s13, %s528_s4  ;;  %p534_p3 = scmp.lt.s32.totalorder %s528_s4, %s528_s4 }
  0x35   :  { %401 = vmatpush3.bf16.msra.mxu1 %v454_v21 }
  0x36   :  { %402 = vmatprep.subr.bf16.mxu1 %v562_v1  ;;  %p535_p4 = por %p534_p3, %p533_p2 }
  0x37   :  { %186 = vmatpush1.bf16.msra.mxu0 %v438_v9 }
  0x38   :  { %187 = vmatprep.subr.bf16.mxu0 %v439_v10  ;;  %p536_p5 = pnand %p535_p4, %p529_p1 }
  0x39   :  { %403 = vmatpush3.bf16.msra.mxu1 %v455_v22 }
  0x3a   :  { %404 = vmatprep.subr.bf16.mxu1 %v562_v1 }
  0x3b   :  { %188 = vmatpush1.bf16.msra.mxu0 %v441_v12 }
  0x3c   :  { %189 = vmatprep.subr.bf16.mxu0 %v442_v14 }
  0x3d   :  { %405 = vmatpush3.bf16.msra.mxu1 %v456_v23 }
  0x3e   :  { %406 = vmatprep.subr.bf16.mxu1 %v562_v1 }
  0x3f   :  { %190 = vmatpush1.bf16.msra.mxu0 %v444_v15 }
  0x40   :  { %191 = vmatprep.subr.bf16.mxu0 %v445_v16 }
  0x41   :  { %407 = vmatpush3.bf16.msra.mxu1 %v457_v24 }
  0x42   :  { %408 = vmatprep.subr.bf16.mxu1 %v562_v1 }
  0x43   :  { %192 = vmatpush1.bf16.msra.mxu0 %v447_v17 }
  0x44   :  { %193 = vmatprep.subr.bf16.mxu0 %v448_v18 }
  0x45   :  { %409 = vmatpush3.bf16.msra.mxu1 %v458_v25 }
  0x46   :  { %410 = vmatprep.subr.bf16.mxu1 %v562_v1 }
  0x47   :  { %194 = vmatpush1.bf16.msra.mxu0 %v450_v19 }
  0x49   :  { %411 = vmatpush3.bf16.msra.mxu1 %v459_v26 }
  0x4a   :  { %212 = vmatmul.mubr.bf16.vlgmr.msra.gmra.mxu0 %v451_v20 }
 0x10a   :  { %v213_v32 = vpop.f32.mrf.mxu0 }
 0x10b   :  { %v214_v33 = vadd.f32 %v213_v32, %v86_v31 }
 0x10c   :  { %v215_v34 = vpop.f32.mrf.mxu0 }
 0x10d   :  { %460 = vtanh.f32 %v214_v33  ;;  %v216_v44 = vadd.f32 %v215_v34, %v90_v41 }
 0x10e   :  { %v217_v35 = vpop.f32.mrf.mxu0 }
 0x10f   :  { %v218_v36 = vadd.f32 %v217_v35, %v86_v31 }
 0x110   :  { %v219_v46 = vpop.f32.mrf.mxu0 }
 0x111   :  { %462 = vtanh.f32 %v218_v36  ;;  %v220_v50 = vadd.f32 %v219_v46, %v90_v41 }
 0x11a   :  { %v461_v37 = vpop.eup %460 }
 0x11e   :  { %v463_v38 = vpop.eup %462 }
 0x11f   :  { %v224_v39 = vpack.c.bf16 %v463_v38, %v461_v37 }
 0x121   :  { %413 = vmatmul.mubr.bf16.vlgmr.msra.gmra.mxu1 %v224_v39 }
 0x1e1   :  { %v330_v43 = vpop.f32.mrf.mxu1 }
 0x1e2   :  { %v331_v45 = vadd.f32 %v378_v42, %v330_v43 }
 0x1e3   :  { %v414_v47 = vpop.f32.mrf.mxu1 }
 0x1e4   :  { %v337_v48 = vadd.f32 %v331_v45, %v216_v44 }
 0x1e5   :  { %v333_v49 = vpop.f32.mrf.mxu1 }
 0x1e6   :  { %464 = vtanh.f32 %v337_v48  ;;  %v334_v51 = vadd.f32 %v378_v42, %v333_v49 }
 0x1e7   :  { %v415_v52 = vpop.f32.mrf.mxu1 }
 0x1e8   :  { %v338_v53 = vadd.f32 %v334_v51, %v220_v50 }
 0x1ea   :  { %466 = vtanh.f32 %v338_v53 }
 0x1f3   :  { %v465_v54 = vpop.eup %464 }
 0x1f4   :  { %341 = vst [vmem:[#allocation8] sm:$0xff] %v465_v54 }
 0x1f7   :  { %v467_v55 = vpop.eup %466 }
 0x1f8   :  { %342 = vst [vmem:[#allocation8 + $0x8] sm:$0xff] %v467_v55 }
 0x1f9   :  { %539 = shalt.err (!%p536_p5)
}
 0x1fa   :  { %354 = dma.vmem_to_hbm [thread:$0]  %s349_s13, 256, %s624_s5, [#allocation4], %s555_s21, %s555_s21, %s556_s22  }
 0x1fb   :  { %552 = dma.done.wait [#allocation4], 256  }
 0x1fc   :  { %553 = vsyncadd [#allocation4], 4294967040 }
 0x1fd   :  { %358 = vsyncpa [#allocation3], 1 }
 0x1fe   :  { %359 = vsyncpa [#allocation6], 1 }
 0x1ff   :  { %360 = vsyncpa [#allocation4], 1 }

</bundles_post_ra>
